<compile_context>
chip_gen: v7x
topology: tpu7x:2x2x1
jax: 0.10.0
libtpu: 0.0.40
codegen_flags: <defaults>
</compile_context>

<pallas_src>
import jax
import jax.numpy as jnp
from jax.experimental import pallas as pl
from jax.experimental.pallas import tpu as pltpu

_LANES = 128
_TILE_TARGET_BYTES = 2 * 1024 * 1024   # per-step input block budget


def _loss_stats_kernel(pred_ref, gt_ref, pdm_ref, sm_ref, out_ref):
    """Per-(batch, spatial-tile) lane-wise partial statistics.

    out_ref block (1, 1, 8, 128) f32, rows:
      [0] sum_{pdm>0} |pred - gt|
      [1] sum(possible_dose_mask)          (validity test)
      [2] count(possible_dose_mask > 0)
      [3] sum_{sm>0} |pred*sm - gt*sm|     (== sum(relu(sm) * |pred-gt|))
      [4] sum(structure_masks)             (validity test)
      [5] count(structure_masks > 0)
      [6], [7] padding (zeros)
    """
    f32 = jnp.float32
    pred = pred_ref[0].astype(f32)   # (Ts, 128)
    gt = gt_ref[0].astype(f32)       # (Ts, 128)
    pdm = pdm_ref[0].astype(f32)     # (Ts, 128)

    abs_diff = jnp.abs(pred - gt)    # computed once, reused for ROI and DVH

    # ROI (possible-dose-mask) term.
    pdm_pos = pdm > 0.0
    roi_vec = jnp.where(pdm_pos, abs_diff, 0.0)
    pdm_cnt_vec = pdm_pos.astype(f32)

    # DVH (structure-mask) term: walk the C channels in registers.
    n_ch = sm_ref.shape[1]
    relu_sm_sum = jnp.zeros_like(abs_diff)
    sm_sum_vec = jnp.zeros_like(abs_diff)
    sm_cnt_vec = jnp.zeros_like(abs_diff)
    for c in range(n_ch):
        sm_c = sm_ref[0, c].astype(f32)          # (Ts, 128)
        pos = sm_c > 0.0
        relu_sm_sum = relu_sm_sum + jnp.where(pos, sm_c, 0.0)
        sm_sum_vec = sm_sum_vec + sm_c
        sm_cnt_vec = sm_cnt_vec + pos.astype(f32)
    dvh_vec = relu_sm_sum * abs_diff             # exact: sm>0 => |sm|=sm

    def row(v):                                  # sublane reduce -> (1, 128)
        return jnp.sum(v, axis=0, keepdims=True)

    zeros = jnp.zeros((1, abs_diff.shape[-1]), f32)
    out_ref[0, 0] = jnp.concatenate(
        [row(roi_vec), row(pdm), row(pdm_cnt_vec),
         row(dvh_vec), row(sm_sum_vec), row(sm_cnt_vec),
         zeros, zeros],
        axis=0)


def _to_lane_dense(x):
    """(B, C, H, W) -> (B, C, S, 128), zero-padded so H*W fills full lanes."""
    b, c, h, w = x.shape
    hw = h * w
    s = -(-hw // _LANES)
    pad = s * _LANES - hw
    x = x.reshape(b, c, hw)
    if pad:
        x = jnp.pad(x, ((0, 0), (0, 0), (0, pad)))
    return x.reshape(b, c, s, _LANES)


def _pad_rows(x, s_pad):
    """Zero-pad the second-to-last (sublane/row) axis up to s_pad."""
    s = x.shape[-2]
    if s_pad <= s:
        return x
    pad_width = [(0, 0)] * (x.ndim - 2) + [(0, s_pad - s), (0, 0)]
    return jnp.pad(x, pad_width)


def loss_sm_roi(pred_dose, gt_dose, possible_dose_mask, structure_masks,
                sm_weight=1.0):
    """Pallas implementation of Loss_SM_ROI.forward (clas=None path)."""
    B = pred_dose.shape[0]
    C = structure_masks.shape[1]

    # Lane-dense reshape (no dtype upcast here; kernel casts in-register).
    pred3 = _to_lane_dense(pred_dose)[:, 0]           # (B, S, 128)
    gt3 = _to_lane_dense(gt_dose)[:, 0]               # (B, S, 128)
    pdm3 = _to_lane_dense(possible_dose_mask)[:, 0]   # (B, S, 128)
    sm4 = _to_lane_dense(structure_masks)             # (B, C, S, 128)
    S = pred3.shape[1]

    # Pick a spatial tile so the per-step input block is ~2 MiB: the
    # double-buffered working set then stays far below the scoped-VMEM
    # default on every chip (v5e/v6e/v7x), with no vmem_limit fiddling.
    bytes_per_row = _LANES * (pred3.dtype.itemsize + gt3.dtype.itemsize
                              + pdm3.dtype.itemsize + C * sm4.dtype.itemsize)
    max_ts = max(8, min(1024, (_TILE_TARGET_BYTES // max(bytes_per_row, 1))
                        // 8 * 8))
    if S <= max_ts:
        ts, n_st = S, 1                               # single tile, no (8,128)
    else:                                             # constraint (full dim)
        ts = max_ts                                   # multiple of 8
        n_st = -(-S // ts)
        s_pad = n_st * ts                             # zero rows are neutral
        pred3 = _pad_rows(pred3, s_pad)
        gt3 = _pad_rows(gt3, s_pad)
        pdm3 = _pad_rows(pdm3, s_pad)
        sm4 = _pad_rows(sm4, s_pad)

    stats = pl.pallas_call(
        _loss_stats_kernel,
        out_shape=jax.ShapeDtypeStruct((B, n_st, 8, _LANES), jnp.float32),
        grid_spec=pltpu.PrefetchScalarGridSpec(
            num_scalar_prefetch=0,
            grid=(B, n_st),
            in_specs=[
                pl.BlockSpec((1, ts, _LANES), lambda b, s: (b, s, 0)),     # pred
                pl.BlockSpec((1, ts, _LANES), lambda b, s: (b, s, 0)),     # gt
                pl.BlockSpec((1, ts, _LANES), lambda b, s: (b, s, 0)),     # pdm
                pl.BlockSpec((1, C, ts, _LANES),
                             lambda b, s: (b, 0, s, 0)),                   # sm
            ],
            out_specs=pl.BlockSpec((1, 1, 8, _LANES),
                                   lambda b, s: (b, s, 0, 0)),
        ),
        compiler_params=pltpu.CompilerParams(
            dimension_semantics=("parallel", "parallel")),
    )(pred3, gt3, pdm3, sm4)

    totals = jnp.sum(stats, axis=(0, 1, 3))           # (8,)
    pdm_abs_sum, pdm_sum, pdm_cnt = totals[0], totals[1], totals[2]
    dvh_abs_sum, sm_sum, dvh_cnt = totals[3], totals[4], totals[5]

    # nn.L1Loss(reduction='mean') over the boolean-selected elements.
    pdmloss = pdm_abs_sum / jnp.maximum(pdm_cnt, 1.0)
    dvhloss = dvh_abs_sum / jnp.maximum(dvh_cnt, 1.0)
    loss = pdmloss + jnp.float32(sm_weight) * dvhloss

    # Fallback branch: L1Loss(zeros(1), zeros(1)) == 0.0
    valid = jnp.logical_and(pdm_sum > 0.0, sm_sum > 0.0)
    return jnp.where(valid, loss, jnp.float32(0.0))


def _reference(pred_dose, gt_dose, pdm, sm, sm_weight=1.0):
    """Pure-JAX reference mirroring the torch forward (clas=None)."""
    pdm_sel = pdm > 0
    sm_sel = sm > 0
    pdmloss = (jnp.sum(jnp.where(pdm_sel, jnp.abs(pred_dose - gt_dose), 0.0))
               / jnp.sum(pdm_sel))
    sminput = pred_dose * sm
    smtarget = gt_dose * sm
    dvhloss = (jnp.sum(jnp.where(sm_sel, jnp.abs(sminput - smtarget), 0.0))
               / jnp.sum(sm_sel))
    full = pdmloss + sm_weight * dvhloss
    valid = jnp.logical_and(jnp.sum(pdm) > 0, jnp.sum(sm) > 0)
    return jnp.where(valid, full, 0.0)


if __name__ == "__main__":
    key = jax.random.PRNGKey(0)
    k1, k2, k3, k4 = jax.random.split(key, 4)

    B, C, H, W = 2, 4, 16, 16         # C = number of structure-mask channels
    sm_weight = 1.0                   # deterministic module "parameter"

    pred_dose = jax.random.normal(k1, (B, 1, H, W), dtype=jnp.float32)
    gt_dose = jax.random.normal(k2, (B, 1, H, W), dtype=jnp.float32)
    possible_dose_mask = (
        jax.random.uniform(k3, (B, 1, H, W)) > 0.3).astype(jnp.float32)
    structure_masks = (
        jax.random.uniform(k4, (B, C, H, W)) > 0.5).astype(jnp.float32)

    out = loss_sm_roi(pred_dose, gt_dose, possible_dose_mask,
                      structure_masks, sm_weight=sm_weight)
    out = jax.block_until_ready(out)

    ref = _reference(pred_dose, gt_dose, possible_dose_mask,
                     structure_masks, sm_weight=sm_weight)
    ref = jax.block_until_ready(ref)

    assert jnp.allclose(out, ref, rtol=1e-5, atol=1e-6), (out, ref)
    print("KERNEL_OK")
</pallas_src>

<mosaic_0001>
module attributes {stable_mosaic.version = 11 : i64} {
  func.func @_loss_stats_kernel(%arg0: i32, %arg1: i32, %arg2: memref<1x2x128xf32, #tpu.memory_space<vmem>>, %arg3: memref<1x2x128xf32, #tpu.memory_space<vmem>>, %arg4: memref<1x2x128xf32, #tpu.memory_space<vmem>>, %arg5: memref<1x4x2x128xf32, #tpu.memory_space<vmem>>, %arg6: memref<1x1x8x128xf32, #tpu.memory_space<vmem>>) attributes {dimension_semantics = [#tpu.dimension_semantics<parallel>, #tpu.dimension_semantics<parallel>], iteration_bounds = array<i64: 2, 1>, scalar_prefetch = 0 : i64, scratch_operands = 0 : i64, tpu.core_type = #tpu.core_type<tc>, window_params = [{transform_indices = @transform_0, window_bounds = array<i64: 1, 2, 128>}, {transform_indices = @transform_1, window_bounds = array<i64: 1, 2, 128>}, {transform_indices = @transform_2, window_bounds = array<i64: 1, 2, 128>}, {transform_indices = @transform_3, window_bounds = array<i64: 1, 4, 2, 128>}, {transform_indices = @transform_4, window_bounds = array<i64: 1, 1, 8, 128>}]} {
    %c0 = arith.constant 0 : index
    %c0_0 = arith.constant 0 : index
    %c0_1 = arith.constant 0 : index
    %0 = vector.load %arg2[%c0, %c0_0, %c0_1] : memref<1x2x128xf32, #tpu.memory_space<vmem>>, vector<1x2x128xf32>
    %1 = vector.shape_cast %0 : vector<1x2x128xf32> to vector<2x128xf32>
    %c0_2 = arith.constant 0 : index
    %c0_3 = arith.constant 0 : index
    %c0_4 = arith.constant 0 : index
    %2 = vector.load %arg3[%c0_2, %c0_3, %c0_4] : memref<1x2x128xf32, #tpu.memory_space<vmem>>, vector<1x2x128xf32>
    %3 = vector.shape_cast %2 : vector<1x2x128xf32> to vector<2x128xf32>
    %c0_5 = arith.constant 0 : index
    %c0_6 = arith.constant 0 : index
    %c0_7 = arith.constant 0 : index
    %4 = vector.load %arg4[%c0_5, %c0_6, %c0_7] : memref<1x2x128xf32, #tpu.memory_space<vmem>>, vector<1x2x128xf32>
    %5 = vector.shape_cast %4 : vector<1x2x128xf32> to vector<2x128xf32>
    %6 = arith.subf %1, %3 : vector<2x128xf32>
    %7 = math.absf %6 : vector<2x128xf32>
    %cst = arith.constant 0.000000e+00 : f32
    %8 = vector.broadcast %cst : f32 to vector<2x128xf32>
    %9 = arith.cmpf ogt, %5, %8 : vector<2x128xf32>
    %cst_8 = arith.constant 0.000000e+00 : f32
    %10 = vector.broadcast %cst_8 : f32 to vector<2x128xf32>
    %11 = arith.select %9, %7, %10 : vector<2x128xi1>, vector<2x128xf32>
    %12 = arith.extui %9 : vector<2x128xi1> to vector<2x128xi32>
    %13 = arith.sitofp %12 : vector<2x128xi32> to vector<2x128xf32>
    %cst_9 = arith.constant 0.000000e+00 : f32
    %14 = vector.broadcast %cst_9 : f32 to vector<2x128xf32>
    %cst_10 = arith.constant 0.000000e+00 : f32
    %15 = vector.broadcast %cst_10 : f32 to vector<2x128xf32>
    %cst_11 = arith.constant 0.000000e+00 : f32
    %16 = vector.broadcast %cst_11 : f32 to vector<2x128xf32>
    %c0_12 = arith.constant 0 : index
    %c0_13 = arith.constant 0 : index
    %c0_14 = arith.constant 0 : index
    %c0_15 = arith.constant 0 : index
    %17 = vector.load %arg5[%c0_12, %c0_13, %c0_14, %c0_15] : memref<1x4x2x128xf32, #tpu.memory_space<vmem>>, vector<1x1x2x128xf32>
    %18 = vector.shape_cast %17 : vector<1x1x2x128xf32> to vector<2x128xf32>
    %cst_16 = arith.constant 0.000000e+00 : f32
    %19 = vector.broadcast %cst_16 : f32 to vector<2x128xf32>
    %20 = arith.cmpf ogt, %18, %19 : vector<2x128xf32>
    %cst_17 = arith.constant 0.000000e+00 : f32
    %21 = vector.broadcast %cst_17 : f32 to vector<2x128xf32>
    %22 = arith.select %20, %18, %21 : vector<2x128xi1>, vector<2x128xf32>
    %23 = arith.addf %14, %22 : vector<2x128xf32>
    %24 = arith.addf %15, %18 : vector<2x128xf32>
    %25 = arith.extui %20 : vector<2x128xi1> to vector<2x128xi32>
    %26 = arith.sitofp %25 : vector<2x128xi32> to vector<2x128xf32>
    %27 = arith.addf %16, %26 : vector<2x128xf32>
    %c0_18 = arith.constant 0 : index
    %c1 = arith.constant 1 : index
    %c0_19 = arith.constant 0 : index
    %c0_20 = arith.constant 0 : index
    %28 = vector.load %arg5[%c0_18, %c1, %c0_19, %c0_20] : memref<1x4x2x128xf32, #tpu.memory_space<vmem>>, vector<1x1x2x128xf32>
    %29 = vector.shape_cast %28 : vector<1x1x2x128xf32> to vector<2x128xf32>
    %cst_21 = arith.constant 0.000000e+00 : f32
    %30 = vector.broadcast %cst_21 : f32 to vector<2x128xf32>
    %31 = arith.cmpf ogt, %29, %30 : vector<2x128xf32>
    %cst_22 = arith.constant 0.000000e+00 : f32
    %32 = vector.broadcast %cst_22 : f32 to vector<2x128xf32>
    %33 = arith.select %31, %29, %32 : vector<2x128xi1>, vector<2x128xf32>
    %34 = arith.addf %23, %33 : vector<2x128xf32>
    %35 = arith.addf %24, %29 : vector<2x128xf32>
    %36 = arith.extui %31 : vector<2x128xi1> to vector<2x128xi32>
    %37 = arith.sitofp %36 : vector<2x128xi32> to vector<2x128xf32>
    %38 = arith.addf %27, %37 : vector<2x128xf32>
    %c0_23 = arith.constant 0 : index
    %c2 = arith.constant 2 : index
    %c0_24 = arith.constant 0 : index
    %c0_25 = arith.constant 0 : index
    %39 = vector.load %arg5[%c0_23, %c2, %c0_24, %c0_25] : memref<1x4x2x128xf32, #tpu.memory_space<vmem>>, vector<1x1x2x128xf32>
    %40 = vector.shape_cast %39 : vector<1x1x2x128xf32> to vector<2x128xf32>
    %cst_26 = arith.constant 0.000000e+00 : f32
    %41 = vector.broadcast %cst_26 : f32 to vector<2x128xf32>
    %42 = arith.cmpf ogt, %40, %41 : vector<2x128xf32>
    %cst_27 = arith.constant 0.000000e+00 : f32
    %43 = vector.broadcast %cst_27 : f32 to vector<2x128xf32>
    %44 = arith.select %42, %40, %43 : vector<2x128xi1>, vector<2x128xf32>
    %45 = arith.addf %34, %44 : vector<2x128xf32>
    %46 = arith.addf %35, %40 : vector<2x128xf32>
    %47 = arith.extui %42 : vector<2x128xi1> to vector<2x128xi32>
    %48 = arith.sitofp %47 : vector<2x128xi32> to vector<2x128xf32>
    %49 = arith.addf %38, %48 : vector<2x128xf32>
    %c0_28 = arith.constant 0 : index
    %c3 = arith.constant 3 : index
    %c0_29 = arith.constant 0 : index
    %c0_30 = arith.constant 0 : index
    %50 = vector.load %arg5[%c0_28, %c3, %c0_29, %c0_30] : memref<1x4x2x128xf32, #tpu.memory_space<vmem>>, vector<1x1x2x128xf32>
    %51 = vector.shape_cast %50 : vector<1x1x2x128xf32> to vector<2x128xf32>
    %cst_31 = arith.constant 0.000000e+00 : f32
    %52 = vector.broadcast %cst_31 : f32 to vector<2x128xf32>
    %53 = arith.cmpf ogt, %51, %52 : vector<2x128xf32>
    %cst_32 = arith.constant 0.000000e+00 : f32
    %54 = vector.broadcast %cst_32 : f32 to vector<2x128xf32>
    %55 = arith.select %53, %51, %54 : vector<2x128xi1>, vector<2x128xf32>
    %56 = arith.addf %45, %55 : vector<2x128xf32>
    %57 = arith.addf %46, %51 : vector<2x128xf32>
    %58 = arith.extui %53 : vector<2x128xi1> to vector<2x128xi32>
    %59 = arith.sitofp %58 : vector<2x128xi32> to vector<2x128xf32>
    %60 = arith.addf %49, %59 : vector<2x128xf32>
    %61 = arith.mulf %56, %7 : vector<2x128xf32>
    %cst_33 = arith.constant 0.000000e+00 : f32
    %62 = vector.broadcast %cst_33 : f32 to vector<1x128xf32>
    %cst_34 = arith.constant dense<0.000000e+00> : vector<128xf32>
    %63 = vector.multi_reduction <add>, %11, %cst_34 [0] : vector<2x128xf32> to vector<128xf32>
    %64 = vector.shape_cast %63 : vector<128xf32> to vector<1x128xf32>
    %cst_35 = arith.constant dense<0.000000e+00> : vector<128xf32>
    %65 = vector.multi_reduction <add>, %5, %cst_35 [0] : vector<2x128xf32> to vector<128xf32>
    %66 = vector.shape_cast %65 : vector<128xf32> to vector<1x128xf32>
    %cst_36 = arith.constant dense<0.000000e+00> : vector<128xf32>
    %67 = vector.multi_reduction <add>, %13, %cst_36 [0] : vector<2x128xf32> to vector<128xf32>
    %68 = vector.shape_cast %67 : vector<128xf32> to vector<1x128xf32>
    %cst_37 = arith.constant dense<0.000000e+00> : vector<128xf32>
    %69 = vector.multi_reduction <add>, %61, %cst_37 [0] : vector<2x128xf32> to vector<128xf32>
    %70 = vector.shape_cast %69 : vector<128xf32> to vector<1x128xf32>
    %cst_38 = arith.constant dense<0.000000e+00> : vector<128xf32>
    %71 = vector.multi_reduction <add>, %57, %cst_38 [0] : vector<2x128xf32> to vector<128xf32>
    %72 = vector.shape_cast %71 : vector<128xf32> to vector<1x128xf32>
    %cst_39 = arith.constant dense<0.000000e+00> : vector<128xf32>
    %73 = vector.multi_reduction <add>, %60, %cst_39 [0] : vector<2x128xf32> to vector<128xf32>
    %74 = vector.shape_cast %73 : vector<128xf32> to vector<1x128xf32>
    %75 = tpu.concatenate %64, %66, %68, %70, %72, %74, %62, %62 in 0 : vector<1x128xf32>, vector<1x128xf32>, vector<1x128xf32>, vector<1x128xf32>, vector<1x128xf32>, vector<1x128xf32>, vector<1x128xf32>, vector<1x128xf32> -> vector<8x128xf32>
    %c0_40 = arith.constant 0 : index
    %c0_41 = arith.constant 0 : index
    %c0_42 = arith.constant 0 : index
    %c0_43 = arith.constant 0 : index
    %76 = vector.load %arg6[%c0_40, %c0_41, %c0_42, %c0_43] : memref<1x1x8x128xf32, #tpu.memory_space<vmem>>, vector<1x1x8x128xf32>
    %77 = vector.shape_cast %76 : vector<1x1x8x128xf32> to vector<8x128xf32>
    %78 = vector.shape_cast %75 : vector<8x128xf32> to vector<1x1x8x128xf32>
    tpu.vector_store %arg6[%c0_40, %c0_41, %c0_42, %c0_43], %78 {strides = array<i32>} : memref<1x1x8x128xf32, #tpu.memory_space<vmem>>, vector<1x1x8x128xf32>,
    return
  }
  func.func @transform_0(%arg0: i32, %arg1: i32) -> (i32, i32, i32) {
    %c0_i32 = arith.constant 0 : i32
    %c0_i32_0 = arith.constant 0 : i32
    return %arg0, %arg1, %c0_i32 : i32, i32, i32
  }
  func.func @transform_1(%arg0: i32, %arg1: i32) -> (i32, i32, i32) {
    %c0_i32 = arith.constant 0 : i32
    %c0_i32_0 = arith.constant 0 : i32
    return %arg0, %arg1, %c0_i32 : i32, i32, i32
  }
  func.func @transform_2(%arg0: i32, %arg1: i32) -> (i32, i32, i32) {
    %c0_i32 = arith.constant 0 : i32
    %c0_i32_0 = arith.constant 0 : i32
    return %arg0, %arg1, %c0_i32 : i32, i32, i32
  }
  func.func @transform_3(%arg0: i32, %arg1: i32) -> (i32, i32, i32, i32) {
    %c0_i32 = arith.constant 0 : i32
    %c0_i32_0 = arith.constant 0 : i32
    %c0_i32_1 = arith.constant 0 : i32
    return %arg0, %c0_i32, %arg1, %c0_i32_0 : i32, i32, i32, i32
  }
  func.func @transform_4(%arg0: i32, %arg1: i32) -> (i32, i32, i32, i32) {
    %c0_i32 = arith.constant 0 : i32
    %c0_i32_0 = arith.constant 0 : i32
    %c0_i32_1 = arith.constant 0 : i32
    return %arg0, %arg1, %c0_i32, %c0_i32_0 : i32, i32, i32, i32
  }
}

</mosaic_0001>

<bundles_post_ra>
// kernel: tpu_custom_call.1
= control target key start
LH: loop header
LB: loop body
LE: loop exit
PB: predicated region body
PF: predicated region fallthrough
CT: control target
= control target key end

     0   :  { %s1192_s0 = inlined_call_operand.hbm [shape: f32[2,2,128], index: 0, kind: input, shape index: {}]   ;;  %s1193_s1 = inlined_call_operand.hbm [shape: f32[2,2,128], index: 1, kind: input, shape index: {}]   ;;  %s1194_s2 = inlined_call_operand.vmem [shape: f32[2,2,128], index: 2, kind: input, shape index: {}]   ;;  %s1195_s3 = inlined_call_operand.hbm [shape: f32[2,4,2,128], index: 3, kind: input, shape index: {}]   ;;  %s1196_s4 = inlined_call_operand.hbm [shape: f32[2,1,8,128], index: 4, kind: output, shape index: {}]  }
   0x1   :  { %1205 = sst [smem:[#allocation16_spill]] %s1193_s1 }
   0x2   :  { %9 = vsyncpa [#allocation3], 0 }
   0x3   :  { %11 = vsyncpa [#allocation3 + $0x1], 0 }
   0x4   :  { %12 = vsyncpa [#allocation6], 0 }
   0x5   :  { %14 = vsyncpa [#allocation6 + $0x1], 0 }
   0x6   :  { %15 = vsyncpa [#allocation4], 0 }
   0x7   :  { %17 = vsyncpa [#allocation4 + $0x1], 0  ;;  %s911_s15 = smov 0   ;;  %s913_s16 = smov 0  }
   0x8   :  { %s915_s17 = smov 0   ;;  %s917_s18 = smov 0  }
   0x9   :  { %s919_s19 = smov 0   ;;  %s921_s20 = smov 0  }
   0xa LB: > { %1206 = sst [smem:[#allocation12_spill]] %s865_s17  ;;  %s942_s21 = sadd.s32 4294967295, %s877_s20   ;;  %s877_s20 = sphi %s921_s20, %s23_s20   ;;  %s873_s19 = sphi %s919_s19, %s1232_s19   ;;  %s869_s18 = sphi %s917_s18, %s1231_s18   ;;  %s865_s17 = sphi %s915_s17, %s1227_s17   ;;  %s861_s16 = sphi %s913_s16, %s1230_s16   ;;  %s857_s15 = sphi %s911_s15, %s1229_s15  }
   0xb   : > { %1207 = sst [smem:[#allocation13_spill]] %s877_s20  ;;  %s597_s22 = sadd.s32 4294967294, %s877_s20  }
   0xc   : > { %s35_s23 = sadd.s32 1, %s873_s19  ;;  %s44_s24 = sadd.s32 1, %s865_s17 }
   0xd   : > { %p37_p0 = scmp.ge.s32.totalorder %s35_s23, 2  ;;  %p51_p1 = scmp.ne.s32.totalorder %s865_s17, %s861_s16 }
   0xe   : > { %p52_p2 = scmp.eq.s32.totalorder %s877_s20, 0  ;;  %p57_p3 = scmp.ne.s32.totalorder %s861_s16, %s857_s15 }
   0xf   : > { %s1234_s23 = smov (%p37_p0, %s35_s23), 0  ;;  %p58_p5 = scmp.eq.s32.totalorder %s942_s21, 0 }
  0x10   : > { %1208 = sst [smem:[#allocation14_spill]] %s1234_s23  ;;  %p954_p4 = por %p52_p2, %p51_p1 }
  0x11   : > { %s39_s26 = ssub.s32 %s873_s19, %s1234_s23  ;;  %p167_p6 = scmp.eq.s32.totalorder %s942_s21, 1 }
  0x12   : > { %p42_p7 = scmp.eq.s32.totalorder %s39_s26, 0  ;;  %p962_p8 = por %p58_p5, %p57_p3 }
  0x13   : > { %p966_p9 = por %p167_p6, %p51_p1  ;;  %p173_p10 = scmp.eq.s32.totalorder %s597_s22, 1 }
  0x14   : > { %s1210_s27 = scalar_select %p962_p8, 1, 0 }
  0x15   : > { %s1211_s28 = scalar_select %p966_p9, 1, 0 }
  0x16   : > { %s971_s29 = scalar_select %p42_p7, %s865_s17, %s44_s24  }
  0x17   : > { %p973_p11 = por %p173_p10, %p57_p3  ;;  %p648_p13 = scmp.lt.s32.totalorder %s877_s20, 2 }
  0x18   : > { %1212 = sst [smem:[#allocation15_spill]] %s971_s29  ;;  %s980_s5 = sand.u32 1, %s865_s17  }
  0x19   : > { %s1213_s30 = scalar_select %p973_p11, 1, 0 }
  0x1a   : > { %s1197_s6 = sshll.u32 %s980_s5, 1  ;;  %s1198_s7 = sshll.u32 %s873_s19, 5 }
  0x1b   : > { %p986_p0 = pnand %p648_p13, %p954_p4  ;;  %s212_s9 = sand.u32 1, %s877_s20  }
  0x1c   : > { %s1215_s1 = sld [smem:[#allocation16_spill]]  ;;  %s216_s13 = scalar_lea.vmem [#allocation5], %s1197_s6 }
  0x1d   : > { %s224_s14 = sshll.u32 %s216_s13, 4  ;;  %s604_s22 = sshll.u32 %s980_s5, 3  ;;  %s1001_s14 = int_to_ptr.vmem [resolvable:$true] %s224_s14 }
  0x1e   : > { %s1003_s24 = scalar_lea.sflag [#allocation6], %s212_s9  ;;  %p1009_p2 = pneg %p986_p0 }
  0x22   : > { %s996_s12 = scalar_lea.hbm %s1215_s1, %s1198_s7  ;;  %s706_s13 = scalar_lea.hbm %s1215_s1, 64 }
  0x23   : > { %s701_s25 = scalar_lea.hbm %s996_s12, 32  ;;  %p707_p5 = scmp.lt.u32.totalorder %s996_s12, %s1215_s1 }
  0x24   : > { %p702_p1 = scmp.ne.s32.totalorder %s996_s12, %s701_s25  ;;  %p708_p6 = scmp.lt.u32.totalorder %s706_s13, %s701_s25 }
  0x25   : > { %p710_p10 = scmp.lt.u32.totalorder %s701_s25, %s996_s12 }
  0x26   : > { %p704_p3 = pnand %p1009_p2, %p702_p1  ;;  %p709_p7 = por %p708_p6, %p707_p5 }
  0x28   : > { %p705_p4 = pneg %p704_p3  ;;  %p711_p13 = por %p710_p10, %p709_p7 }
  0x2a   : > { %p712_p12 = pnand %p711_p13, %p705_p4 }
  0x2c   : > { %715 = shalt.err (!%p712_p12)
}
  0x2d   : > { %s716_s9 = scalar_lea.vmem %s1001_s14, 32  ;;  %s879_s10 = smov [#allocation5]  }
  0x2e   : > { %p717_p1 = scmp.ne.s32.totalorder %s1001_s14, %s716_s9  ;;  %s721_s11 = sshll.u32 %s879_s10, 4  ;;  %s722_s11 = int_to_ptr.vmem [resolvable:$false] %s721_s11 }
  0x2f   : > { %s723_s6 = scalar_lea.vmem %s722_s11, 64  ;;  %p724_p9 = scmp.lt.s32.totalorder %s1001_s14, %s722_s11 }
  0x30   : > { %p719_p3 = pnand %p717_p1, %p1009_p2  ;;  %p725_p8 = scmp.lt.s32.totalorder %s723_s6, %s716_s9 }
  0x32   : > { %p720_p11 = pneg %p719_p3  ;;  %p726_p5 = por %p725_p8, %p724_p9 }
  0x34   : > { %p727_p6 = pnand %p726_p5, %p720_p11 }
  0x36   : > { %730 = shalt.err (!%p727_p6)
}
  0x37   : > { %640 = dma.hbm_to_vmem [thread:$0]  (!%p986_p0), %s996_s12, 32, %s1001_s14, %s1003_s24  }
  0x38   : > { %s245_s7 = scalar_lea.vmem [#allocation7], %s604_s22  ;;  %p607_p8 = scmp.ge.s32.totalorder %s877_s20, 1 }
  0x39   : > { %s253_s25 = sshll.u32 %s245_s7, 4  ;;  %p261_p9 = scmp.lt.s32.totalorder %s877_s20, 3  ;;  %s1036_s25 = int_to_ptr.vmem [resolvable:$true] %s253_s25 }
  0x3a   : > { %s1218_s9 = sshll.u32 %s873_s19, 5  ;;  %s1219_s1 = sshll.u32 %s980_s5, 1 }
  0x3b   : > { %p1039_p11 = pnand %p607_p8, %p261_p9  ;;  %s1048_s6 = scalar_lea.hbm %s1192_s0, %s1218_s9 }
  0x3c   : > { %s197_s12 = scalar_lea.vmem [#allocation2], %s1219_s1  ;;  %s625_s22 = sshll.u32 %s873_s19, 7 }
  0x3d   : > { %s1217_s13 = scalar_select %p1039_p11, 1, 0 }
  0x3e   : > { %s205_s14 = sshll.u32 %s197_s12, 4  ;;  %s1058_s29 = scalar_lea.hbm %s1195_s3, %s625_s22  ;;  %s1053_s14 = int_to_ptr.vmem [resolvable:$true] %s205_s14 }
  0x3f   : > { %s194_s17 = scalar_lea.sflag [#allocation3], %s980_s5  ;;  %s731_s20 = scalar_lea.hbm %s1048_s6, 32 }
  0x40   : > { %p732_p12 = scmp.ne.s32.totalorder %s1048_s6, %s731_s20  ;;  %s736_s11 = scalar_lea.hbm %s1192_s0, 64 }
  0x41   : > { %p737_p10 = scmp.lt.u32.totalorder %s1048_s6, %s1192_s0  ;;  %p738_p13 = scmp.lt.u32.totalorder %s736_s11, %s731_s20 }
  0x42   : > { %p734_p4 = pnand %p732_p12, %p1009_p2  ;;  %p740_p3 = scmp.lt.u32.totalorder %s731_s20, %s1048_s6 }
  0x43   : > { %p739_p1 = por %p738_p13, %p737_p10 }
  0x44   : > { %p735_p7 = pneg %p734_p4 }
  0x45   : > { %p741_p5 = por %p740_p3, %p739_p1 }
  0x47   : > { %p742_p6 = pnand %p741_p5, %p735_p7 }
  0x49   : > { %745 = shalt.err (!%p742_p6)
}
  0x4a   : > { %s746_s23 = scalar_lea.vmem %s1053_s14, 32  ;;  %s880_s5 = smov [#allocation2]  }
  0x4b   : > { %p747_p8 = scmp.ne.s32.totalorder %s1053_s14, %s746_s23  ;;  %s751_s22 = sshll.u32 %s880_s5, 4  ;;  %s752_s22 = int_to_ptr.vmem [resolvable:$false] %s751_s22 }
  0x4c   : > { %s753_s7 = scalar_lea.vmem %s752_s22, 64  ;;  %p754_p4 = scmp.lt.s32.totalorder %s1053_s14, %s752_s22 }
  0x4d   : > { %p749_p9 = pnand %p747_p8, %p1009_p2  ;;  %p755_p11 = scmp.lt.s32.totalorder %s753_s7, %s746_s23 }
  0x4f   : > { %p750_p12 = pneg %p749_p9  ;;  %p756_p10 = por %p755_p11, %p754_p4 }
  0x51   : > { %p757_p13 = pnand %p756_p10, %p750_p12 }
  0x53   : > { %760 = shalt.err (!%p757_p13)
}
  0x54   : > { %637 = dma.hbm_to_vmem [thread:$0]  (!%p986_p0), %s1048_s6, 32, %s1053_s14, %s194_s17  }
  0x55   : > { %s761_s20 = scalar_lea.hbm %s1058_s29, 128  ;;  %s766_s11 = scalar_lea.hbm %s1195_s3, 256 }
  0x56   : > { %p762_p7 = scmp.ne.s32.totalorder %s1058_s29, %s761_s20  ;;  %p767_p11 = scmp.lt.u32.totalorder %s1058_s29, %s1195_s3 }
  0x57   : > { %p768_p5 = scmp.lt.u32.totalorder %s766_s11, %s761_s20  ;;  %p770_p8 = scmp.lt.u32.totalorder %s761_s20, %s1058_s29 }
  0x58   : > { %p764_p1 = pnand %p762_p7, %p1009_p2 }
  0x59   : > { %p769_p6 = por %p768_p5, %p767_p11 }
  0x5a   : > { %p765_p3 = pneg %p764_p1 }
  0x5b   : > { %p771_p9 = por %p770_p8, %p769_p6 }
  0x5d   : > { %p772_p12 = pnand %p771_p9, %p765_p3 }
  0x5f   : > { %775 = shalt.err (!%p772_p12)
}
  0x60   : > { %s776_s17 = scalar_lea.vmem %s1036_s25, 128  ;;  %s881_s6 = smov [#allocation7]  }
  0x61   : > { %p777_p4 = scmp.ne.s32.totalorder %s1036_s25, %s776_s17  ;;  %s781_s14 = sshll.u32 %s881_s6, 4  ;;  %s782_s14 = int_to_ptr.vmem [resolvable:$false] %s781_s14 }
  0x62   : > { %s783_s23 = scalar_lea.vmem %s782_s14, 256  ;;  %p784_p7 = scmp.lt.s32.totalorder %s1036_s25, %s782_s14 }
  0x63   : > { %p779_p10 = pnand %p777_p4, %p1009_p2  ;;  %p785_p1 = scmp.lt.s32.totalorder %s783_s23, %s776_s17 }
  0x65   : > { %p780_p13 = pneg %p779_p10  ;;  %p786_p11 = por %p785_p1, %p784_p7 }
  0x67   : > { %p787_p5 = pnand %p786_p11, %p780_p13 }
  0x69   : > { %790 = shalt.err (!%p787_p5)
}
  0x6a   : > { %s882_s5 = smov 32   ;;  %s883_s22 = smov 2  }
  0x6b   : > { %643 = dma.hbm_to_vmem [thread:$0]  (!%p986_p0), %s1058_s29, 128, %s1036_s25, %s1003_s24, %s882_s5, %s882_s5, %s883_s22  }
  0x6c   : > { %p1220_p2 = scmp.ne.s32.totalorder %s1217_s13, 0 }
  0x6d   : > { %s1107_s26 = sand.u32 (!%p1220_p2), 1, %s861_s16   ;;  %p1221_p3 = scmp.ne.s32.totalorder (!%p1220_p2), %s1210_s27, 0 }
  0x6e   : > { %265 = sbr.rel (%p1220_p2) target bundleno = 166 (0xa6), region = 36  ;;  %s608_s7 = sshll.u32 (!%p1220_p2), %s1107_s26, 1 }
  0x6f   : > { %s268_s20 = scalar_lea.sflag (!%p1220_p2), [#allocation3], %s1107_s26  ;;  %s271_s9 = scalar_lea.vmem (!%p1220_p2), [#allocation2], %s608_s7 }
  0x75   : > { %844 = dma.done.wait (%p1221_p3), %s268_s20, 32  }
  0x76   : > { %846 = vsyncadd (%p1221_p3), %s268_s20, 4294967264  ;;  %s276_s29 = sand.u32 1, %s942_s21   ;;  %s280_s24 = scalar_lea.vmem [#allocation5], %s608_s7 }
  0x77   : > { %s277_s8 = scalar_lea.sflag [#allocation6], %s276_s29 }
  0x78   : > { %848 = dma.done.wait (%p1221_p3), %s277_s8, 160  }
  0x79   : > { %850 = vsyncadd (%p1221_p3), %s277_s8, 4294967136  ;;  %p331_p0 = scmp.lt.s32.totalorder %s869_s18, 1  ;;  %s610_s25 = sshll.u32 %s1107_s26, 3  ;;  %vm383_vm0 = vcmask 1041408   ;;  %v338_v0 = vld [vmem:[%s271_s9] sm:$0x3] }
  0x7a   : > { %v339_v1 = vld [vmem:[%s280_s24] sm:$0x3]  ;;  %s289_s21 = scalar_lea.vmem [#allocation7], %s610_s25  ;;  %v884_v7 = vmov 0.0   ;;  %vm426_vm6 = vcmask 1040384   ;;  %vm429_vm7 = vcmask 1042432  }
  0x7b   : > { %s332_s13 = scalar_select %p331_p0, %s869_s18, 1  ;;  %v341_v3 = vsub.f32 %v338_v0, %v339_v1  ;;  %v347_v4 = vld [vmem:[%s289_s21] sm:$0x3]  ;;  %v615_v5 = vld [vmem:[%s289_s21 + $0x2] sm:$0x3]  ;;  %vm431_vm8 = vcmask 1043456  }
  0x7c   : > { %vm348_vm2 = vcmp.gt.f32.partialorder %v347_v4, 0.0  ;;  %vm357_vm3 = vcmp.gt.f32.partialorder %v615_v5, 0.0  ;;  %v360_v9 = vadd.f32 %v615_v5, %v347_v4  ;;  %v617_v10 = vld [vmem:[%s289_s21 + $0x4] sm:$0x3]  ;;  %v619_v18 = vld [vmem:[%s289_s21 + $0x6] sm:$0x3] }
  0x7d   : > { %s612_s10 = sshll.u32 %s332_s13, 1  ;;  %v342_v11 = vand.u32 2147483647, %v341_v3  ;;  %v349_v12 = vsel %vm348_vm2, %v347_v4, 0.0  ;;  %v614_v13 = vsel %vm348_vm2, 1.0, %v884_v7  ;;  %v358_v14 = vsel %vm357_vm3, %v615_v5, 0.0 }
  0x7e   : > { %s337_s12 = scalar_lea.vmem %s1194_s2, %s612_s10  ;;  %v359_v15 = vadd.f32 %v358_v14, %v349_v12  ;;  %v616_v16 = vsel %vm357_vm3, 1.0, %v884_v7  ;;  %vm366_vm4 = vcmp.gt.f32.partialorder %v617_v10, 0.0  ;;  %v369_v17 = vadd.f32 %v617_v10, %v360_v9  ;;  %s330_s27 = scalar_lea.vmem [#allocation8], %s610_s25 }
  0x7f   : > { %v340_v2 = vld [vmem:[%s337_s12] sm:$0x3]  ;;  %v363_v20 = vadd.f32 %v616_v16, %v614_v13  ;;  %v367_v21 = vsel %vm366_vm4, %v617_v10, 0.0  ;;  %v618_v22 = vsel %vm366_vm4, 1.0, %v884_v7  ;;  %vm375_vm5 = vcmp.gt.f32.partialorder %v619_v18, 0.0  ;;  %s455_s17 = sshll.u32 %s330_s27, 4  ;;  %s1140_s17 = int_to_ptr.vmem [resolvable:$true] %s455_s17 }
  0x80   : > { %vm343_vm1 = vcmp.gt.f32.partialorder %v340_v2, 0.0  ;;  %v391_v6 = vsel %vm383_vm0, %v340_v2, 0.0  ;;  %v368_v23 = vadd.f32 %v367_v21, %v359_v15  ;;  %v378_v24 = vadd.f32 %v619_v18, %v369_v17  ;;  %s622_s6 = sshll.u32 %s869_s18, 7  ;;  %s441_s22 = scalar_lea.sflag [#allocation4], %s1107_s26 }
  0x81   : > { %v613_v8 = vsel %vm343_vm1, 1.0, %v884_v7  ;;  %v344_v19 = vsel %vm343_vm1, %v342_v11, 0.0  ;;  %v372_v26 = vadd.f32 %v618_v22, %v363_v20  ;;  %v376_v27 = vsel %vm375_vm5, %v619_v18, 0.0  ;;  %s1145_s5 = scalar_lea.hbm %s1196_s4, %s622_s6  ;;  %s791_s7 = scalar_lea.vmem %s1140_s17, 128 }
  0x82   : > { %v384_v25 = vsel %vm383_vm0, %v344_v19, 0.0  ;;  %v620_v28 = vsel %vm375_vm5, 1.0, %v884_v7  ;;  %v377_v30 = vadd.f32 %v376_v27, %v368_v23  ;;  %v392_v31 = vrot.slane %v391_v6, 4  ;;  %p792_p6 = scmp.ne.s32.totalorder %s1140_s17, %s791_s7  ;;  %p1222_p8 = scmp.ne.s32.totalorder %s1211_s28, 0 }
  0x83   : > { %v385_v29 = vrot.slane %v384_v25, 4  ;;  %v398_v32 = vsel %vm383_vm0, %v613_v8, 0.0  ;;  %v412_v33 = vsel %vm383_vm0, %v378_v24, 0.0  ;;  %v381_v34 = vadd.f32 %v620_v28, %v372_v26  ;;  %s885_s18 = smov [#allocation8]  }
  0x84   : > { %v399_v36 = vrot.slane %v398_v32, 4  ;;  %v413_v37 = vrot.slane %v412_v33, 4  ;;  %v382_v38 = vmul.f32 %v377_v30, %v342_v11  ;;  %v393_v39 = vadd.f32 %v392_v31, %v391_v6  ;;  %p793_p9 = pnand %p792_p6, %p1222_p8  ;;  %s795_s20 = sshll.u32 %s885_s18, 4  ;;  %s796_s20 = int_to_ptr.vmem [resolvable:$false] %s795_s20 }
  0x85   : > { %v386_v35 = vadd.f32 %v385_v29, %v384_v25  ;;  %v419_v43 = vsel %vm383_vm0, %v381_v34, 0.0  ;;  %vm433_vm9 = vcmask 1044480   ;;  %vm435_vm10 = vcmask 1045504   ;;  %s797_s9 = scalar_lea.vmem %s796_s20, 256  ;;  %p798_p4 = scmp.lt.s32.totalorder %s1140_s17, %s796_s20 }
  0x86   : > { %v400_v41 = vadd.f32 %v399_v36, %v398_v32  ;;  %v414_v42 = vadd.f32 %v413_v37, %v412_v33  ;;  %v394_v44 = vrot.slane %v393_v39, 2  ;;  %v405_v45 = vsel %vm383_vm0, %v382_v38, 0.0  ;;  %p794_p12 = pneg %p793_p9  ;;  %p799_p10 = scmp.lt.s32.totalorder %s797_s9, %s791_s7 }
  0x87   : > { %v387_v40 = vrot.slane %v386_v35, 2  ;;  %v420_v46 = vrot.slane %v419_v43, 4  ;;  %v406_v49 = vrot.slane %v405_v45, 4  ;;  %vm437_vm11 = vcmask 1046528  }
  0x88   : > { %v401_v48 = vrot.slane %v400_v41, 2  ;;  %v415_v50 = vrot.slane %v414_v42, 2  ;;  %v395_v51 = vadd.f32 %v394_v44, %v393_v39  ;;  %p800_p13 = por %p799_p10, %p798_p4 }
  0x89   : > { %v388_v47 = vadd.f32 %v387_v40, %v386_v35  ;;  %v421_v52 = vadd.f32 %v420_v46, %v419_v43  ;;  %v407_v55 = vadd.f32 %v406_v49, %v405_v45 }
  0x8a   : > { %v402_v54 = vadd.f32 %v401_v48, %v400_v41  ;;  %v416_v56 = vadd.f32 %v415_v50, %v414_v42  ;;  %v396_v57 = vrot.slane %v395_v51, 1  ;;  %p801_p7 = pnand %p800_p13, %p794_p12 }
  0x8b   : > { %v389_v53 = vrot.slane %v388_v47, 1  ;;  %v422_v58 = vrot.slane %v421_v52, 2  ;;  %v408_v61 = vrot.slane %v407_v55, 2 }
  0x8c   : > { %v403_v60 = vrot.slane %v402_v54, 1  ;;  %v397_v62 = vadd.f32 %v396_v57, %v395_v51  ;;  %v417_v63 = vrot.slane %v416_v56, 1 }
  0x8d   : > { %v390_v59 = vadd.f32 %v389_v53, %v388_v47  ;;  %v423_v0 = vadd.f32 %v422_v58, %v421_v52  ;;  %v409_v2 = vadd.f32 %v408_v61, %v407_v55 }
  0x8e   : > { %v404_v1 = vadd.f32 %v403_v60, %v402_v54  ;;  %v418_v6 = vadd.f32 %v417_v63, %v416_v56 }
  0x8f   : > { %v424_v3 = vrot.slane %v423_v0, 1  ;;  %v427_v4 = vsel %vm426_vm6, %v390_v59, %v397_v62  ;;  %v410_v5 = vrot.slane %v409_v2, 1 }
  0x90   : > { %v428_v7 = vsel %vm383_vm0, %v427_v4, %v404_v1 }
  0x91   : > { %v411_v8 = vadd.f32 %v410_v5, %v409_v2  ;;  %v425_v9 = vadd.f32 %v424_v3, %v423_v0 }
  0x93   : > { %v430_v10 = vsel %vm429_vm7, %v428_v7, %v411_v8 }
  0x94   : > { %v432_v11 = vsel %vm431_vm8, %v430_v10, %v418_v6 }
  0x95   : > { %v434_v12 = vsel %vm433_vm9, %v432_v11, %v425_v9 }
  0x96   : > { %v436_v13 = vsel %vm435_vm10, %v434_v12, 0.0 }
  0x97   : > { %v438_v14 = vsel %vm437_vm11, %v436_v13, 0.0 }
  0x98   : > { %439 = vst [vmem:[%s330_s27] sm:$0xff] %v438_v14 }
  0x99   : > { %804 = shalt.err (!%p801_p7)
}
  0x9a   : > { %s805_s26 = scalar_lea.hbm %s1145_s5, 128  ;;  %s809_s24 = scalar_lea.hbm %s1196_s4, 256 }
  0x9b   : > { %p806_p1 = scmp.ne.s32.totalorder %s1145_s5, %s805_s26  ;;  %p810_p2 = scmp.lt.u32.totalorder %s1145_s5, %s1196_s4 }
  0x9c   : > { %p811_p3 = scmp.lt.u32.totalorder %s809_s24, %s805_s26  ;;  %p813_p6 = scmp.lt.u32.totalorder %s805_s26, %s1145_s5 }
  0x9d   : > { %p807_p11 = pnand %p806_p1, %p1222_p8 }
  0x9e   : > { %p812_p0 = por %p811_p3, %p810_p2 }
  0x9f   : > { %p808_p5 = pneg %p807_p11 }
  0xa0   : > { %p814_p9 = por %p813_p6, %p812_p0 }
  0xa2   : > { %p815_p12 = pnand %p814_p9, %p808_p5 }
  0xa4   : > { %818 = shalt.err (!%p815_p12)
}
  0xa5   : > { %632 = dma.vmem_to_hbm [thread:$0]  (%p1222_p8), %s1140_s17, 128, %s1145_s5, %s441_s22  }
  0xa6 PF: > { %s1223_s10 = sld [smem:[#allocation13_spill]]  ;;  %s467_s11 = sand.u32 1, %s857_s15  }
  0xa7   : > { %p1224_p4 = scmp.ne.s32.totalorder %s1213_s30, 0  ;;  %s468_s1 = scalar_lea.sflag [#allocation4], %s467_s11 }
  0xac   : > { %p1225_p10 = scmp.ge.s32.totalorder %s1223_s10, 2 }
  0xae   : > { %p645_p13 = pnand %p1225_p10, %p1224_p4 }
  0xb0   : > { %852 = dma.done.wait (!%p645_p13), %s468_s1, 128  }
  0xb1   : > { %854 = vsyncadd (!%p645_p13), %s468_s1, 4294967168  ;;  %s23_s20 = sadd.s32 1, %s1223_s10   ;;  %s1226_s12 = sld [smem:[#allocation12_spill]] }
  0xb2   : > { %p20_p7 = scmp.ge.s32.totalorder %s23_s20, 4   ;;  %s1227_s17 = sld [smem:[#allocation15_spill]] }
  0xb3   : > { %s1228_s28 = sld [smem:[#allocation14_spill]]  ;;  %s1229_s15 = smov %s861_s16 }
  0xb4   : > { %s1231_s18 = smov %s873_s19  ;;  %22 = sbr.rel (!%p20_p7) target bundleno = 10 (0xa), region = 111 }
  0xb7   : > { %s1230_s16 = smov %s1226_s12 }
  0xb9   : > { %s1232_s19 = smov %s1228_s28 }
  0xbb   :  { %473 = vsyncpa [#allocation3], 1 }
  0xbc   :  { %475 = vsyncpa [#allocation3 + $0x1], 1 }
  0xbd   :  { %476 = vsyncpa [#allocation6], 1 }
  0xbe   :  { %478 = vsyncpa [#allocation6 + $0x1], 1 }
  0xbf   :  { %479 = vsyncpa [#allocation4], 1 }
  0xc0   :  { %481 = vsyncpa [#allocation4 + $0x1], 1 }

</bundles_post_ra>
